<compile_context>
chip_gen: v6e
topology: v6e:2x2x1
jax: 0.10.0
libtpu: 0.0.40
codegen_flags: <defaults>
</compile_context>

<pallas_src>
from functools import partial

import jax
import jax.numpy as jnp
from jax import lax
from jax.experimental import pallas as pl
from jax.experimental.pallas import tpu as pltpu

_LOG2 = 0.6931471805599453


def _mse_with_alive_kernel(n_valid, inv_total,
                           x_ref, y_ref, meta_ref, bins_ref, w_ref,
                           out_ref, acc_ref):
    """One lane-dense tile of TN samples.

    x_ref, y_ref : (B, TN) logits / BCE labels (samples on lanes, bins on sublanes)
    meta_ref     : (3, TN) rows = [target_time, alive, pseudo]
    bins_ref     : (B, 1)  survival-bin values
    w_ref        : (1,)    SMEM scalar `weight`
    out_ref      : (1, 1)  SMEM scalar loss (written on the last grid step)
    acc_ref      : (4,)    SMEM accumulators:
                           [sum_bce_true, sum_bce_pseudo, true_count, pseudo_count]
    """
    tn = x_ref.shape[1]
    step = pl.program_id(0)

    @pl.when(step == 0)
    def _init():
        for i in range(4):
            acc_ref[i] = jnp.float32(0.0)

    x = x_ref[...]                      # (B, TN)
    y = y_ref[...]                      # (B, TN)
    tgt = meta_ref[0:1, :]              # (1, TN)
    alv = meta_ref[1:2, :]              # (1, TN)
    psd = meta_ref[2:3, :]              # (1, TN)
    bins = bins_ref[...]                # (B, 1)

    # Validity mask over the zero-padded tail of the sample axis.
    if n_valid % tn == 0:
        mask = jnp.ones((1, tn), jnp.float32)
    else:
        col = step * tn + lax.broadcasted_iota(jnp.int32, (1, tn), 1)
        mask = (col < n_valid).astype(jnp.float32)

    # inputs_sum = sum_b bins[b] * inputs[:, b]   (8-sublane XLU reduce)
    isum = jnp.sum(bins * x, axis=0, keepdims=True)             # (1, TN)
    # alive_index = 1 - clamp(inputs_sum - target, 0, 1) * alive
    a = 1.0 - jnp.clip(isum - tgt, 0.0, 1.0) * alv              # (1, TN), in [0, 1]
    s_t = (psd == 2.0).astype(jnp.float32)                      # true_index
    s_p = (psd == 1.0).astype(jnp.float32)                      # pseudo_index

    # Selected rows of BOTH branches use the same scaled logits x*alive_index;
    # unselected rows have logits 0 and target 0 -> per-element BCE = log(2).
    z = x * a                                                   # (B, TN)
    e = jnp.exp(-jnp.abs(z))                                    # single EUP exp, shared
    # softplus term log1p(e), e in (0,1]: for tiny e, log1p(e) == e to f32 precision.
    # This keeps log1p-level accuracy without relying on a log1p lowering.
    softplus = jnp.where(e < 1e-3, e, jnp.log(1.0 + e))         # one EUP log
    base = jnp.maximum(z, 0.0) + softplus                       # (B, TN)

    # Per-element BCEWithLogits contributions of the two full-(N*B)-mean losses.
    contrib_true = s_t * (base - z * (y * a)) + (mask - s_t) * _LOG2
    contrib_pseudo = s_p * (base - z * y) + (mask - s_p) * _LOG2

    acc_ref[0] = acc_ref[0] + jnp.sum(contrib_true)
    acc_ref[1] = acc_ref[1] + jnp.sum(contrib_pseudo)
    acc_ref[2] = acc_ref[2] + jnp.sum(s_t * (a != 0.0).astype(jnp.float32))
    acc_ref[3] = acc_ref[3] + jnp.sum(s_p)

    @pl.when(step == pl.num_programs(0) - 1)
    def _finalize():
        mean_true = acc_ref[0] * inv_total
        mean_pseudo = acc_ref[1] * inv_total
        cnt_true = acc_ref[2]
        cnt_pseudo = acc_ref[3]
        loss_true = jnp.where(cnt_true > 0.0, mean_true, jnp.float32(0.0))
        # Reference quirk reproduced verbatim: the pseudo branch overwrites
        # loss_true, and loss_pseudo is never assigned (stays 0).
        loss_true = jnp.where(cnt_pseudo > 0.0, mean_pseudo, loss_true)
        loss_pseudo = jnp.float32(0.0)
        w = w_ref[0]
        out_ref[0, 0] = loss_true * w + loss_pseudo * (1.0 - w)
    # TODO(synk): the reference's host-side print of loss/true_count and
    # inputs[1, :] is a data-dependent host I/O side-effect; not reproduced.


def mse_with_alive(inputs, target, target_label, alive, pseudo, bins,
                   weight=0.7, block_n=8192):
    N, B = inputs.shape
    f32 = jnp.float32

    # Lane-dense relayout: samples (N) on the lane axis, bins (B) on sublanes.
    x_t = inputs.astype(f32).T                                   # (B, N)
    y_t = target_label.astype(f32).T                             # (B, N)
    meta = jnp.stack([target.reshape(-1).astype(f32),
                      alive.reshape(-1).astype(f32),
                      pseudo.reshape(-1).astype(f32)], axis=0)   # (3, N)
    bins_c = bins.reshape(-1).astype(f32).reshape(B, 1)          # (B, 1)

    # Lane-aligned sample tile. Per-step VMEM ≈ (2*B + 3)*TN*4 bytes, double
    # buffered: ~1.2 MiB at TN=8192, B=8 — well inside v7x's 64 MiB VMEM (and the
    # 32 MiB default scoped limit). Shrink block_n if B is large; grow it on
    # v5e/v6e (128 MiB VMEM) for very large N.
    tn = max(128, (block_n // 128) * 128)
    tn = min(tn, pl.cdiv(N, 128) * 128)
    n_pad = pl.cdiv(N, tn) * tn
    if n_pad != N:
        pad = ((0, 0), (0, n_pad - N))
        x_t = jnp.pad(x_t, pad)          # zero padding -> pseudo=0 -> unselected rows,
        y_t = jnp.pad(y_t, pad)          # masked out in-kernel anyway
        meta = jnp.pad(meta, pad)

    w_arr = jnp.asarray([weight], dtype=f32)
    kernel = partial(_mse_with_alive_kernel, N, 1.0 / (N * B))

    # TODO(synk): on v7x (2 TensorCores) the sequential reduction could instead emit
    # per-tile partial sums with dimension_semantics=("parallel",) and be combined in
    # the wrapper for up to ~2x at large N.
    loss = pl.pallas_call(
        kernel,
        out_shape=jax.ShapeDtypeStruct((1, 1), f32),
        grid=(n_pad // tn,),
        in_specs=[
            pl.BlockSpec((B, tn), lambda i: (0, i)),             # logits
            pl.BlockSpec((B, tn), lambda i: (0, i)),             # labels
            pl.BlockSpec((3, tn), lambda i: (0, i)),             # [target, alive, pseudo]
            pl.BlockSpec((B, 1), lambda i: (0, 0)),              # bins (constant block)
            pl.BlockSpec(memory_space=pltpu.MemorySpace.SMEM),   # weight scalar
        ],
        out_specs=pl.BlockSpec(memory_space=pltpu.MemorySpace.SMEM),
        scratch_shapes=[pltpu.SMEM((4,), f32)],
        compiler_params=pltpu.CompilerParams(
            dimension_semantics=("arbitrary",)),
    )(x_t, y_t, meta, bins_c, w_arr)
    return loss[0, 0]


def _reference(inputs, target, target_label, alive, pseudo, bins, weight=0.7):
    """Pure-JAX transcription of MSE_with_alive.forward (PyTorch semantics)."""
    x = inputs.astype(jnp.float32)
    y = target_label.astype(jnp.float32)
    target = target.reshape(-1).astype(jnp.float32)
    alive = alive.reshape(-1).astype(jnp.float32)
    pseudo = pseudo.reshape(-1).astype(jnp.float32)
    bins = bins.reshape(-1).astype(jnp.float32)

    inputs_sum = jnp.sum(x * bins[None, :], axis=1)
    alive_index = (1.0 - jnp.clip(inputs_sum - target, 0.0, 1.0) * alive)[:, None]
    true_index = (pseudo == 2.0).astype(jnp.float32)[:, None]
    pseudo_index = (pseudo == 1.0).astype(jnp.float32)[:, None]

    def bce_mean(logits, labels):
        return jnp.mean(jnp.maximum(logits, 0.0) - logits * labels
                        + jnp.log1p(jnp.exp(-jnp.abs(logits))))

    loss_true_branch = bce_mean(x * (true_index * alive_index),
                                y * (true_index * alive_index))
    loss_pseudo_branch = bce_mean(x * (pseudo_index * alive_index),
                                  y * pseudo_index)
    true_count = jnp.count_nonzero(alive_index * true_index)
    pseudo_count = jnp.count_nonzero(pseudo_index)

    loss_true = jnp.where(true_count != 0, loss_true_branch, 0.0)
    loss_true = jnp.where(pseudo_count != 0, loss_pseudo_branch, loss_true)  # verbatim
    loss_pseudo = 0.0
    return loss_true * weight + loss_pseudo * (1.0 - weight)


if __name__ == "__main__":
    key = jax.random.PRNGKey(0)
    k1, k2, k3, k4, k5 = jax.random.split(key, 5)

    N, B = 300, 8            # samples, survival bins (small)
    inputs = jax.random.normal(k1, (N, B), dtype=jnp.float32)
    target = jax.random.uniform(k2, (N,), minval=0.0, maxval=600.0, dtype=jnp.float32)
    target_label = jax.random.bernoulli(k3, 0.5, (N, B)).astype(jnp.float32)
    alive = jax.random.bernoulli(k4, 0.5, (N,)).astype(jnp.float32)
    pseudo_mixed = jax.random.randint(k5, (N,), 0, 3).astype(jnp.float32)
    bins = jnp.linspace(50.0, 550.0, B, dtype=jnp.float32)

    cases = [
        ("mixed", pseudo_mixed, 0.7),
        ("true_rows_only", jnp.full((N,), 2.0, jnp.float32), 0.7),
        ("no_selected_rows", jnp.zeros((N,), jnp.float32), 0.3),
    ]
    for name, pseudo, weight in cases:
        got = mse_with_alive(inputs, target, target_label, alive, pseudo, bins,
                             weight=weight, block_n=128)   # 128-lane tiles -> 3 grid steps
        got = jax.block_until_ready(got)
        want = _reference(inputs, target, target_label, alive, pseudo, bins, weight)
        assert jnp.allclose(got, want, atol=1e-4, rtol=1e-4), (name, got, want)

    print("KERNEL_OK")
</pallas_src>

<mosaic_0001>
module attributes {stable_mosaic.version = 11 : i64} {
  func.func @_mse_with_alive_kernel(%arg0: i32, %arg1: memref<8x128xf32, #tpu.memory_space<vmem>>, %arg2: memref<8x128xf32, #tpu.memory_space<vmem>>, %arg3: memref<3x128xf32, #tpu.memory_space<vmem>>, %arg4: memref<8x1xf32, #tpu.memory_space<vmem>>, %arg5: memref<1xf32, #tpu.memory_space<smem>>, %arg6: memref<1x1xf32, #tpu.memory_space<smem>>, %arg7: memref<4xf32, #tpu.memory_space<smem>>) attributes {dimension_semantics = [#tpu.dimension_semantics<arbitrary>], iteration_bounds = array<i64: 3>, scalar_prefetch = 0 : i64, scratch_operands = 1 : i64, tpu.core_type = #tpu.core_type<tc>, window_params = [{transform_indices = @transform_0, window_bounds = array<i64: 8, 128>}, {transform_indices = @transform_1, window_bounds = array<i64: 8, 128>}, {transform_indices = @transform_2, window_bounds = array<i64: 3, 128>}, {pipeline_mode = #tpu.pipeline_mode<synchronous>, transform_indices = @transform_3, window_bounds = array<i64: 8, 1>}, {transform_indices = @transform_4, window_bounds = array<i64: 1>}, {transform_indices = @transform_5, window_bounds = array<i64: 1, 1>}]} {
    %c0_i32 = arith.constant 0 : i32
    %0 = arith.cmpi eq, %arg0, %c0_i32 : i32
    %1 = arith.extui %0 : i1 to i32
    %c0_i32_0 = arith.constant 0 : i32
    %2 = arith.cmpi ne, %1, %c0_i32_0 : i32
    scf.if %2 {
      %cst_34 = arith.constant 0.000000e+00 : f32
      %c0_35 = arith.constant 0 : index
      %108 = memref.load %arg7[%c0_35] : memref<4xf32, #tpu.memory_space<smem>>
      memref.store %cst_34, %arg7[%c0_35] : memref<4xf32, #tpu.memory_space<smem>>
      %cst_36 = arith.constant 0.000000e+00 : f32
      %c1_37 = arith.constant 1 : index
      %109 = memref.load %arg7[%c1_37] : memref<4xf32, #tpu.memory_space<smem>>
      memref.store %cst_36, %arg7[%c1_37] : memref<4xf32, #tpu.memory_space<smem>>
      %cst_38 = arith.constant 0.000000e+00 : f32
      %c2_39 = arith.constant 2 : index
      %110 = memref.load %arg7[%c2_39] : memref<4xf32, #tpu.memory_space<smem>>
      memref.store %cst_38, %arg7[%c2_39] : memref<4xf32, #tpu.memory_space<smem>>
      %cst_40 = arith.constant 0.000000e+00 : f32
      %c3_41 = arith.constant 3 : index
      %111 = memref.load %arg7[%c3_41] : memref<4xf32, #tpu.memory_space<smem>>
      memref.store %cst_40, %arg7[%c3_41] : memref<4xf32, #tpu.memory_space<smem>>
    } else {
    }
    %c0 = arith.constant 0 : index
    %c0_1 = arith.constant 0 : index
    %3 = vector.load %arg1[%c0, %c0_1] : memref<8x128xf32, #tpu.memory_space<vmem>>, vector<8x128xf32>
    %c0_2 = arith.constant 0 : index
    %c0_3 = arith.constant 0 : index
    %4 = vector.load %arg2[%c0_2, %c0_3] : memref<8x128xf32, #tpu.memory_space<vmem>>, vector<8x128xf32>
    %c0_4 = arith.constant 0 : index
    %c0_5 = arith.constant 0 : index
    %5 = vector.load %arg3[%c0_4, %c0_5] : memref<3x128xf32, #tpu.memory_space<vmem>>, vector<1x128xf32>
    %c1 = arith.constant 1 : index
    %c0_6 = arith.constant 0 : index
    %6 = vector.load %arg3[%c1, %c0_6] : memref<3x128xf32, #tpu.memory_space<vmem>>, vector<1x128xf32>
    %c2 = arith.constant 2 : index
    %c0_7 = arith.constant 0 : index
    %7 = vector.load %arg3[%c2, %c0_7] : memref<3x128xf32, #tpu.memory_space<vmem>>, vector<1x128xf32>
    %c0_8 = arith.constant 0 : index
    %c0_9 = arith.constant 0 : index
    %8 = vector.load %arg4[%c0_8, %c0_9] : memref<8x1xf32, #tpu.memory_space<vmem>>, vector<8x1xf32>
    %c128_i32 = arith.constant 128 : i32
    %9 = arith.muli %arg0, %c128_i32 : i32
    %10 = tpu.iota {dimensions = array<i32: 1>} : vector<1x128xi32>
    %11 = vector.broadcast %9 : i32 to vector<1x128xi32>
    %12 = arith.addi %11, %10 : vector<1x128xi32>
    %c300_i32 = arith.constant 300 : i32
    %13 = vector.broadcast %c300_i32 : i32 to vector<1x128xi32>
    %14 = arith.cmpi slt, %12, %13 : vector<1x128xi32>
    %15 = arith.extui %14 : vector<1x128xi1> to vector<1x128xi32>
    %16 = arith.sitofp %15 : vector<1x128xi32> to vector<1x128xf32>
    %17 = vector.broadcast %8 : vector<8x1xf32> to vector<8x128xf32>
    %18 = arith.mulf %17, %3 : vector<8x128xf32>
    %cst = arith.constant dense<0.000000e+00> : vector<128xf32>
    %19 = vector.multi_reduction <add>, %18, %cst [0] : vector<8x128xf32> to vector<128xf32>
    %20 = vector.shape_cast %19 : vector<128xf32> to vector<1x128xf32>
    %21 = arith.subf %20, %5 : vector<1x128xf32>
    %cst_10 = arith.constant 0.000000e+00 : f32
    %cst_11 = arith.constant 1.000000e+00 : f32
    %22 = vector.broadcast %cst_10 : f32 to vector<1x128xf32>
    %23 = arith.maximumf %22, %21 : vector<1x128xf32>
    %24 = vector.broadcast %cst_11 : f32 to vector<1x128xf32>
    %25 = arith.minimumf %24, %23 : vector<1x128xf32>
    %26 = arith.mulf %25, %6 : vector<1x128xf32>
    %cst_12 = arith.constant 1.000000e+00 : f32
    %27 = vector.broadcast %cst_12 : f32 to vector<1x128xf32>
    %28 = arith.subf %27, %26 : vector<1x128xf32>
    %cst_13 = arith.constant 2.000000e+00 : f32
    %29 = vector.broadcast %cst_13 : f32 to vector<1x128xf32>
    %30 = arith.cmpf oeq, %7, %29 : vector<1x128xf32>
    %31 = arith.extui %30 : vector<1x128xi1> to vector<1x128xi32>
    %32 = arith.sitofp %31 : vector<1x128xi32> to vector<1x128xf32>
    %cst_14 = arith.constant 1.000000e+00 : f32
    %33 = vector.broadcast %cst_14 : f32 to vector<1x128xf32>
    %34 = arith.cmpf oeq, %7, %33 : vector<1x128xf32>
    %35 = arith.extui %34 : vector<1x128xi1> to vector<1x128xi32>
    %36 = arith.sitofp %35 : vector<1x128xi32> to vector<1x128xf32>
    %37 = vector.broadcast %28 : vector<1x128xf32> to vector<8x128xf32>
    %38 = arith.mulf %3, %37 : vector<8x128xf32>
    %39 = math.absf %38 : vector<8x128xf32>
    %cst_15 = arith.constant 0.000000e+00 : f32
    %40 = vector.broadcast %cst_15 : f32 to vector<8x128xf32>
    %41 = arith.subf %40, %39 : vector<8x128xf32>
    %42 = math.exp %41 : vector<8x128xf32>
    %cst_16 = arith.constant 1.000000e-03 : f32
    %43 = vector.broadcast %cst_16 : f32 to vector<8x128xf32>
    %44 = arith.cmpf olt, %42, %43 : vector<8x128xf32>
    %cst_17 = arith.constant 1.000000e+00 : f32
    %45 = vector.broadcast %cst_17 : f32 to vector<8x128xf32>
    %46 = arith.addf %45, %42 : vector<8x128xf32>
    %47 = math.log %46 : vector<8x128xf32>
    %48 = arith.select %44, %42, %47 : vector<8x128xi1>, vector<8x128xf32>
    %cst_18 = arith.constant 0.000000e+00 : f32
    %49 = vector.broadcast %cst_18 : f32 to vector<8x128xf32>
    %50 = arith.maximumf %38, %49 : vector<8x128xf32>
    %51 = arith.addf %50, %48 : vector<8x128xf32>
    %52 = vector.broadcast %28 : vector<1x128xf32> to vector<8x128xf32>
    %53 = arith.mulf %4, %52 : vector<8x128xf32>
    %54 = arith.mulf %38, %53 : vector<8x128xf32>
    %55 = arith.subf %51, %54 : vector<8x128xf32>
    %56 = vector.broadcast %32 : vector<1x128xf32> to vector<8x128xf32>
    %57 = arith.mulf %56, %55 : vector<8x128xf32>
    %58 = arith.subf %16, %32 : vector<1x128xf32>
    %cst_19 = arith.constant 0.693147182 : f32
    %59 = vector.broadcast %cst_19 : f32 to vector<1x128xf32>
    %60 = arith.mulf %58, %59 : vector<1x128xf32>
    %61 = vector.broadcast %60 : vector<1x128xf32> to vector<8x128xf32>
    %62 = arith.addf %57, %61 : vector<8x128xf32>
    %63 = arith.mulf %38, %4 : vector<8x128xf32>
    %64 = arith.subf %51, %63 : vector<8x128xf32>
    %65 = vector.broadcast %36 : vector<1x128xf32> to vector<8x128xf32>
    %66 = arith.mulf %65, %64 : vector<8x128xf32>
    %67 = arith.subf %16, %36 : vector<1x128xf32>
    %cst_20 = arith.constant 0.693147182 : f32
    %68 = vector.broadcast %cst_20 : f32 to vector<1x128xf32>
    %69 = arith.mulf %67, %68 : vector<1x128xf32>
    %70 = vector.broadcast %69 : vector<1x128xf32> to vector<8x128xf32>
    %71 = arith.addf %66, %70 : vector<8x128xf32>
    %c0_21 = arith.constant 0 : index
    %72 = memref.load %arg7[%c0_21] : memref<4xf32, #tpu.memory_space<smem>>
    %73 = vector.shape_cast %62 : vector<8x128xf32> to vector<1x8x128xf32>
    %cst_22 = arith.constant dense<0.000000e+00> : vector<1xf32>
    %74 = vector.multi_reduction <add>, %73, %cst_22 [1, 2] : vector<1x8x128xf32> to vector<1xf32>
    %75 = vector.shape_cast %74 : vector<1xf32> to vector<1x1x1xf32>
    %76 = vector.extract %75[0, 0, 0] : f32 from vector<1x1x1xf32>
    %77 = arith.addf %72, %76 : f32
    %c0_23 = arith.constant 0 : index
    %78 = memref.load %arg7[%c0_23] : memref<4xf32, #tpu.memory_space<smem>>
    memref.store %77, %arg7[%c0_23] : memref<4xf32, #tpu.memory_space<smem>>
    %c1_24 = arith.constant 1 : index
    %79 = memref.load %arg7[%c1_24] : memref<4xf32, #tpu.memory_space<smem>>
    %80 = vector.shape_cast %71 : vector<8x128xf32> to vector<1x8x128xf32>
    %cst_25 = arith.constant dense<0.000000e+00> : vector<1xf32>
    %81 = vector.multi_reduction <add>, %80, %cst_25 [1, 2] : vector<1x8x128xf32> to vector<1xf32>
    %82 = vector.shape_cast %81 : vector<1xf32> to vector<1x1x1xf32>
    %83 = vector.extract %82[0, 0, 0] : f32 from vector<1x1x1xf32>
    %84 = arith.addf %79, %83 : f32
    %c1_26 = arith.constant 1 : index
    %85 = memref.load %arg7[%c1_26] : memref<4xf32, #tpu.memory_space<smem>>
    memref.store %84, %arg7[%c1_26] : memref<4xf32, #tpu.memory_space<smem>>
    %c2_27 = arith.constant 2 : index
    %86 = memref.load %arg7[%c2_27] : memref<4xf32, #tpu.memory_space<smem>>
    %cst_28 = arith.constant 0.000000e+00 : f32
    %87 = vector.broadcast %cst_28 : f32 to vector<1x128xf32>
    %88 = arith.cmpf one, %28, %87 : vector<1x128xf32>
    %89 = arith.extui %88 : vector<1x128xi1> to vector<1x128xi32>
    %90 = arith.sitofp %89 : vector<1x128xi32> to vector<1x128xf32>
    %91 = arith.mulf %32, %90 : vector<1x128xf32>
    %92 = vector.shape_cast %91 : vector<1x128xf32> to vector<1x1x128xf32>
    %cst_29 = arith.constant dense<0.000000e+00> : vector<1xf32>
    %93 = vector.multi_reduction <add>, %92, %cst_29 [1, 2] : vector<1x1x128xf32> to vector<1xf32>
    %94 = vector.shape_cast %93 : vector<1xf32> to vector<1x1x1xf32>
    %95 = vector.extract %94[0, 0, 0] : f32 from vector<1x1x1xf32>
    %96 = arith.addf %86, %95 : f32
    %c2_30 = arith.constant 2 : index
    %97 = memref.load %arg7[%c2_30] : memref<4xf32, #tpu.memory_space<smem>>
    memref.store %96, %arg7[%c2_30] : memref<4xf32, #tpu.memory_space<smem>>
    %c3 = arith.constant 3 : index
    %98 = memref.load %arg7[%c3] : memref<4xf32, #tpu.memory_space<smem>>
    %99 = vector.shape_cast %36 : vector<1x128xf32> to vector<1x1x128xf32>
    %cst_31 = arith.constant dense<0.000000e+00> : vector<1xf32>
    %100 = vector.multi_reduction <add>, %99, %cst_31 [1, 2] : vector<1x1x128xf32> to vector<1xf32>
    %101 = vector.shape_cast %100 : vector<1xf32> to vector<1x1x1xf32>
    %102 = vector.extract %101[0, 0, 0] : f32 from vector<1x1x1xf32>
    %103 = arith.addf %98, %102 : f32
    %c3_32 = arith.constant 3 : index
    %104 = memref.load %arg7[%c3_32] : memref<4xf32, #tpu.memory_space<smem>>
    memref.store %103, %arg7[%c3_32] : memref<4xf32, #tpu.memory_space<smem>>
    %c2_i32 = arith.constant 2 : i32
    %105 = arith.cmpi eq, %arg0, %c2_i32 : i32
    %106 = arith.extui %105 : i1 to i32
    %c0_i32_33 = arith.constant 0 : i32
    %107 = arith.cmpi ne, %106, %c0_i32_33 : i32
    scf.if %107 {
      %c0_34 = arith.constant 0 : index
      %108 = memref.load %arg7[%c0_34] : memref<4xf32, #tpu.memory_space<smem>>
      %cst_35 = arith.constant 4.16666677E-4 : f32
      %109 = arith.mulf %108, %cst_35 : f32
      %c1_36 = arith.constant 1 : index
      %110 = memref.load %arg7[%c1_36] : memref<4xf32, #tpu.memory_space<smem>>
      %cst_37 = arith.constant 4.16666677E-4 : f32
      %111 = arith.mulf %110, %cst_37 : f32
      %c2_38 = arith.constant 2 : index
      %112 = memref.load %arg7[%c2_38] : memref<4xf32, #tpu.memory_space<smem>>
      %c3_39 = arith.constant 3 : index
      %113 = memref.load %arg7[%c3_39] : memref<4xf32, #tpu.memory_space<smem>>
      %cst_40 = arith.constant 0.000000e+00 : f32
      %114 = arith.cmpf ogt, %112, %cst_40 : f32
      %cst_41 = arith.constant 0.000000e+00 : f32
      %115 = arith.select %114, %109, %cst_41 : f32
      %cst_42 = arith.constant 0.000000e+00 : f32
      %116 = arith.cmpf ogt, %113, %cst_42 : f32
      %117 = arith.select %116, %111, %115 : f32
      %c0_43 = arith.constant 0 : index
      %118 = memref.load %arg5[%c0_43] : memref<1xf32, #tpu.memory_space<smem>>
      %119 = arith.mulf %117, %118 : f32
      %cst_44 = arith.constant 1.000000e+00 : f32
      %120 = arith.subf %cst_44, %118 : f32
      %cst_45 = arith.constant 0.000000e+00 : f32
      %121 = arith.mulf %cst_45, %120 : f32
      %122 = arith.addf %119, %121 : f32
      %c0_46 = arith.constant 0 : index
      %c0_47 = arith.constant 0 : index
      %123 = memref.load %arg6[%c0_46, %c0_47] : memref<1x1xf32, #tpu.memory_space<smem>>
      memref.store %122, %arg6[%c0_46, %c0_47] : memref<1x1xf32, #tpu.memory_space<smem>>
    } else {
    }
    return
  }
  func.func @transform_0(%arg0: i32) -> (i32, i32) {
    %c0_i32 = arith.constant 0 : i32
    %c0_i32_0 = arith.constant 0 : i32
    return %c0_i32, %arg0 : i32, i32
  }
  func.func @transform_1(%arg0: i32) -> (i32, i32) {
    %c0_i32 = arith.constant 0 : i32
    %c0_i32_0 = arith.constant 0 : i32
    return %c0_i32, %arg0 : i32, i32
  }
  func.func @transform_2(%arg0: i32) -> (i32, i32) {
    %c0_i32 = arith.constant 0 : i32
    %c0_i32_0 = arith.constant 0 : i32
    return %c0_i32, %arg0 : i32, i32
  }
  func.func @transform_3(%arg0: i32) -> (i32, i32) {
    %c0_i32 = arith.constant 0 : i32
    %c0_i32_0 = arith.constant 0 : i32
    %c0_i32_1 = arith.constant 0 : i32
    return %c0_i32, %c0_i32_0 : i32, i32
  }
  func.func @transform_4(%arg0: i32) -> i32 {
    %c0_i32 = arith.constant 0 : i32
    %c0_i32_0 = arith.constant 0 : i32
    return %c0_i32 : i32
  }
  func.func @transform_5(%arg0: i32) -> (i32, i32) {
    %c0_i32 = arith.constant 0 : i32
    %c0_i32_0 = arith.constant 0 : i32
    %c0_i32_1 = arith.constant 0 : i32
    return %c0_i32, %c0_i32_0 : i32, i32
  }
}

</mosaic_0001>

<bundles_post_ra>
// kernel: tpu_custom_call.1
= control target key start
LH: loop header
LB: loop body
LE: loop exit
PB: predicated region body
PF: predicated region fallthrough
CT: control target
= control target key end

     0   :  { %s976_s0 = inlined_call_operand.hbm [shape: f32[8,384], index: 0, kind: input, shape index: {}]   ;;  %s977_s1 = inlined_call_operand.hbm [shape: f32[8,384], index: 1, kind: input, shape index: {}]   ;;  %s978_s2 = inlined_call_operand.vmem [shape: f32[3,384], index: 2, kind: input, shape index: {}]   ;;  %s979_s3 = inlined_call_operand.vmem [shape: f32[8,1], index: 3, kind: input, shape index: {}]   ;;  %s980_s4 = inlined_call_operand.<no memory space> [shape: f32[1], index: 4, kind: input, shape index: {}]   ;;  %s981_s5 = inlined_call_operand.hbm [shape: f32[1,1], index: 5, kind: output, shape index: {}]  }
   0x1   :  { %10 = sst [smem:[#allocation3]] %s980_s4 }
   0x2   :  { %11 = vsyncpa [#allocation5], 0 }
   0x3   :  { %13 = vsyncpa [#allocation5 + $0x1], 0 }
   0x4   :  { %14 = vsyncpa [#allocation8], 0 }
   0x5   :  { %16 = vsyncpa [#allocation8 + $0x1], 0 }
   0x6   :  { %17 = vsyncpa [#allocation6], 0  ;;  %s801_s20 = smov 0   ;;  %s803_s21 = smov 0  }
   0x7   :  { %s805_s22 = smov 0   ;;  %s807_s23 = smov 0  }
   0x8 LB: > { %s820_s4 = sadd.s32 4294967295, %s760_s23   ;;  %s823_s24 = sadd.s32 1, %s760_s23   ;;  %s760_s23 = sphi %s807_s23, %s998_s23   ;;  %s756_s22 = sphi %s805_s22, %s997_s22   ;;  %s752_s21 = sphi %s803_s21, %s996_s21   ;;  %s748_s20 = sphi %s801_s20, %s995_s20  }
   0x9   : > { %s27_s25 = ssub.s32 %s760_s23, %s823_s24  ;;  %s30_s26 = sadd.s32 1, %s756_s22 }
   0xa   : > { %p28_p0 = scmp.eq.s32.totalorder %s27_s25, 0  ;;  %p37_p1 = scmp.ne.s32.totalorder %s756_s22, %s752_s21 }
   0xb   : > { %p38_p2 = scmp.eq.s32.totalorder %s760_s23, 0  ;;  %p43_p3 = scmp.ne.s32.totalorder %s752_s21, %s748_s20 }
   0xc   : > { %s833_s27 = scalar_select %p28_p0, %s756_s22, %s30_s26  }
   0xd   : > { %p39_p4 = por %p38_p2, %p37_p1  ;;  %p982_p5 = scmp.eq.s32.totalorder %s820_s4, 0 }
   0xe   : > { %p606_p6 = scmp.lt.s32.totalorder %s760_s23, 3  ;;  %s844_s29 = sand.u32 1, %s756_s22  }
   0xf   : > { %p839_p7 = por %p982_p5, %p43_p3  ;;  %s551_s30 = sshll.u32 %s844_s29, 3 }
  0x10   : > { %s552_s6 = sshll.u32 %s760_s23, 7  ;;  %s192_s10 = scalar_lea.vmem [#allocation4], %s551_s30 }
  0x11   : > { %s984_s28 = scalar_select %p839_p7, 1, 0 }
  0x12   : > { %s853_s9 = scalar_lea.hbm %s976_s0, %s552_s6  ;;  %s199_s11 = sshll.u32 %s192_s10, 4  ;;  %s857_s11 = int_to_ptr.vmem [resolvable:$true] %s199_s11 }
  0x13   : > { %p859_p8 = pnand %p606_p6, %p39_p4  ;;  %s189_s13 = scalar_lea.sflag [#allocation5], %s844_s29 }
  0x14   : > { %s652_s14 = scalar_lea.hbm %s853_s9, 128  ;;  %s657_s17 = scalar_lea.hbm %s976_s0, 384 }
  0x15   : > { %p653_p11 = scmp.ne.s32.totalorder %s853_s9, %s652_s14  ;;  %p654_p12 = pneg %p859_p8 }
  0x16   : > { %p658_p1 = scmp.lt.s32.totalorder %s853_s9, %s976_s0  ;;  %p659_p2 = scmp.lt.s32.totalorder %s657_s17, %s652_s14 }
  0x17   : > { %p655_p13 = pnand %p654_p12, %p653_p11 }
  0x18   : > { %p660_p3 = por %p659_p2, %p658_p1 }
  0x19   : > { %p656_p0 = pneg %p655_p13 }
  0x1b   : > { %p661_p4 = pnand %p660_p3, %p656_p0 }
  0x1d   : > { %664 = shalt.err (!%p661_p4)
}
  0x1e   : > { %s665_s20 = scalar_lea.vmem %s857_s11, 128  ;;  %s762_s25 = smov [#allocation4]  }
  0x1f   : > { %p666_p6 = scmp.ne.s32.totalorder %s857_s11, %s665_s20  ;;  %s670_s26 = sshll.u32 %s762_s25, 4  ;;  %s671_s26 = int_to_ptr.vmem [resolvable:$false] %s670_s26 }
  0x20   : > { %s672_s7 = scalar_lea.vmem %s671_s26, 256  ;;  %p673_p5 = scmp.lt.s32.totalorder %s857_s11, %s671_s26 }
  0x21   : > { %p668_p11 = pnand %p666_p6, %p654_p12  ;;  %p674_p9 = scmp.lt.s32.totalorder %s672_s7, %s665_s20 }
  0x23   : > { %p669_p13 = pneg %p668_p11  ;;  %p675_p10 = por %p674_p9, %p673_p5 }
  0x25   : > { %p676_p1 = pnand %p675_p10, %p669_p13 }
  0x27   : > { %679 = shalt.err (!%p676_p1)
}
  0x28   : > { %602 = dma.hbm_to_vmem [thread:$0]  (!%p859_p8), %s853_s9, 128, %s857_s11, %s189_s13  }
  0x29   : > { %p986_p0 = scmp.lt.s32.totalorder %s760_s23, 4  ;;  %p987_p2 = scmp.ge.s32.totalorder %s760_s23, 1 }
  0x2a   : > { %s903_s15 = scalar_lea.hbm %s977_s1, %s552_s6  ;;  %s210_s16 = scalar_lea.vmem [#allocation7], %s551_s30 }
  0x2b   : > { %p894_p3 = pnand %p987_p2, %p986_p0  ;;  %s217_s17 = sshll.u32 %s210_s16, 4  ;;  %s218_s17 = int_to_ptr.vmem [resolvable:$true] %s217_s17 }
  0x2c   : > { %s207_s9 = scalar_lea.sflag [#allocation8], %s844_s29  ;;  %s680_s11 = scalar_lea.hbm %s903_s15, 128 }
  0x2d   : > { %s988_s8 = scalar_select %p894_p3, 1, 0 }
  0x2e   : > { %p681_p5 = scmp.ne.s32.totalorder %s903_s15, %s680_s11  ;;  %s685_s18 = scalar_lea.hbm %s977_s1, 384 }
  0x2f   : > { %p686_p4 = scmp.lt.s32.totalorder %s903_s15, %s977_s1  ;;  %p687_p6 = scmp.lt.s32.totalorder %s685_s18, %s680_s11 }
  0x30   : > { %p683_p9 = pnand %p681_p5, %p654_p12 }
  0x31   : > { %p688_p11 = por %p687_p6, %p686_p4 }
  0x32   : > { %p684_p10 = pneg %p683_p9 }
  0x34   : > { %p689_p13 = pnand %p688_p11, %p684_p10 }
  0x36   : > { %692 = shalt.err (!%p689_p13)
}
  0x37   : > { %s693_s30 = scalar_lea.vmem %s218_s17, 128  ;;  %s763_s29 = smov [#allocation7]  }
  0x38   : > { %p694_p1 = scmp.ne.s32.totalorder %s218_s17, %s693_s30  ;;  %s698_s20 = sshll.u32 %s763_s29, 4  ;;  %s699_s20 = int_to_ptr.vmem [resolvable:$false] %s698_s20 }
  0x39   : > { %s700_s25 = scalar_lea.vmem %s699_s20, 256  ;;  %p701_p5 = scmp.lt.s32.totalorder %s218_s17, %s699_s20 }
  0x3a   : > { %p696_p0 = pnand %p694_p1, %p654_p12  ;;  %p702_p9 = scmp.lt.s32.totalorder %s700_s25, %s693_s30 }
  0x3c   : > { %p697_p2 = pneg %p696_p0  ;;  %p703_p7 = por %p702_p9, %p701_p5 }
  0x3e   : > { %p704_p3 = pnand %p703_p7, %p697_p2 }
  0x40   : > { %707 = shalt.err (!%p704_p3)
}
  0x41   : > { %605 = dma.hbm_to_vmem [thread:$0]  (!%p859_p8), %s903_s15, 128, %s218_s17, %s207_s9  }
  0x42   : > { %p989_p10 = scmp.ne.s32.totalorder %s988_s8, 0 }
  0x43   : > { %s235_s26 = sand.u32 (!%p989_p10), 1, %s752_s21   ;;  %p990_p12 = scmp.ne.s32.totalorder (!%p989_p10), %s984_s28, 0 }
  0x44   : > { %233 = sbr.rel (%p989_p10) target bundleno = 496 (0x1f0), region = 40  ;;  %s556_s7 = sshll.u32 (!%p989_p10), %s235_s26, 3 }
  0x45   : > { %s236_s10 = scalar_lea.sflag (!%p989_p10), [#allocation5], %s235_s26  ;;  %s239_s14 = scalar_lea.vmem (!%p989_p10), [#allocation4], %s556_s7 }
  0x49   : > { %735 = dma.done.wait (%p990_p12), %s236_s10, 128  }
  0x4a   : > { %737 = vsyncadd (%p990_p12), %s236_s10, 4294967168  ;;  %s245_s16 = scalar_lea.sflag [#allocation8], %s235_s26  ;;  %s933_s11 = scalar_lea.vmem [#allocation7], %s556_s7 }
  0x4b   : > { %739 = dma.done.wait (%p990_p12), %s245_s16, 128  }
  0x4c   : > { %741 = vsyncadd (%p990_p12), %s245_s16, 4294967168  ;;  %v764_v0 = vmov 0   ;;  %v300_v1 = vld [vmem:[%s979_s3] sm:$0xff]  ;;  %p279_p7 = scmp.lt.s32.totalorder %s820_s4, 2  ;;  %v302_v11 = vlaneseq  ;;  %v765_v22 = vmov 0.0   ;;  %vm408_vm2 = vcmask 1040384  }
  0x4d   : > { %647 = vset.pattern.permute.xlu0 %v764_v0  ;;  %v295_v2 = vld [vmem:[%s239_s14] sm:$0xff]  ;;  %s560_s13 = sshll.u32 %s820_s4, 7  ;;  %v296_v39 = vld [vmem:[%s933_s11] sm:$0xff]  ;;  %s766_s18 = smov 0.0  }
  0x4e   : > { %311 = vperm.xlu0 %647, %v300_v1   ;;  %s280_s15 = scalar_select %p279_p7, %s820_s4, 2  ;;  %v333_v14 = vshrl.u32 %v302_v11, 7  ;;  %v303_v32 = vand.u32 127, %v302_v11  ;;  %v304_v34 = vstv %s560_s13 }
  0x4f   : > { %p991_p8 = scmp.eq.s32.totalorder %s820_s4, 0  ;;  %s450_s6 = sld [smem:[#allocation3]] }
  0x50   : > { %s558_s17 = sshll.u32 %s280_s15, 2  ;;  %v334_v19 = vsub.s32 0, %v333_v14  ;;  %v305_v36 = vadd.s32 %v304_v34, %v303_v32  ;;  %p608_p1 = scmp.eq.s32.totalorder %s820_s4, 2 }
  0x51   : > { %s282_s23 = scalar_lea.vmem %s978_s2, %s558_s17  ;;  %589 = sst [smem:[#allocation2]] (%p991_p8), %s766_s18 }
  0x52   : > { %v297_v10 = vld [vmem:[%s282_s23] sm:$0x1]  ;;  %v298_v16 = vld [vmem:[%s282_s23 + $0x1] sm:$0x1]  ;;  %v299_v17 = vld [vmem:[%s282_s23 + $0x2] sm:$0x1]  ;;  %p992_p3 = pmov %p991_p8 }
  0x53   : > { %vm326_vm0 = vcmp.eq.f32.partialorder %v299_v17, 2.0  ;;  %vm329_vm3 = vcmp.eq.f32.partialorder %v299_v17, 1.0  ;;  %vm306_vm4 = vcmp.lt.s32.totalorder %v305_v36, 300  ;;  %s377_s19 = sld [smem:[#allocation2]]  ;;  %s767_s13 = smov [#allocation9]  }
  0x54   : > { %v562_v23 = vsel %vm326_vm0, 1.0, %v765_v22  ;;  %v561_v37 = vsel %vm306_vm4, 1.0, %v765_v22  ;;  %v563_v38 = vsel %vm329_vm3, 1.0, %v765_v22  ;;  %590 = sst [smem:[#allocation2 + $0x1]] (%p992_p3), %s766_s18  ;;  %p993_p4 = pmov %p992_p3 }
  0x55   : > { %v370_v40 = vsub.f32 %v561_v37, %v563_v38  ;;  %v356_v41 = vsub.f32 %v561_v37, %v562_v23  ;;  %v368_v49 = vrot.slane %v563_v38, %v334_v19  ;;  %v354_v53 = vrot.slane %v562_v23, %v334_v19  ;;  %p994_p6 = pmov %p992_p3  ;;  %s564_s30 = sld [smem:[#allocation2 + $0x1]] }
  0x56   : > { %v423_v62 = vsel %vm408_vm2, %v563_v38, 0.0  ;;  %591 = sst [smem:[#allocation2 + $0x2]] (%p993_p4), %s766_s18 }
  0x57   : > { %v371_v45 = vmul.f32 0.6931472, %v370_v40  ;;  %v357_v47 = vmul.f32 0.6931472, %v356_v41  ;;  %592 = sst [smem:[#allocation2 + $0x3]] (%p994_p6), %s766_s18 }
  0x58   : > { %s565_s29 = sld [smem:[#allocation2 + $0x2]] }
  0x59   : > { %v375_v55 = vrot.slane %v371_v45, %v334_v19  ;;  %v361_v57 = vrot.slane %v357_v47, %v334_v19  ;;  %s567_s20 = sld [smem:[#allocation2 + $0x3]] }
  0x5a   : > { %s452_s26 = ssub.f32 1.0, %s450_s6 }
  0x5c   : > { %s453_s28 = smul.f32 0.0, %s452_s26 }
  0xc9   : > { %v312_v3 = vpop.permute.xlu0 %311 }
  0xca   : > { %v314_v4 = vmul.f32 %v312_v3, %v295_v2 }
  0xcc   : > { %v315_v5 = vrot.slane %v314_v4, 4 }
  0xce   : > { %v316_v6 = vadd.f32 %v315_v5, %v314_v4 }
  0xd0   : > { %v317_v7 = vrot.slane %v316_v6, 2 }
  0xd2   : > { %v318_v8 = vadd.f32 %v317_v7, %v316_v6 }
  0xd4   : > { %v319_v9 = vrot.slane %v318_v8, 1 }
  0xd6   : > { %v320_v12 = vadd.f32 %v319_v9, %v318_v8 }
  0xd8   : > { %v321_v13 = vsub.f32 %v320_v12, %v297_v10 }
  0xda   : > { %v322_v15 = vmax.f32 %v321_v13, 0.0 }
  0xdc   : > { %v323_v18 = vmin.f32 %v322_v15, 1.0 }
  0xde   : > { %v324_v20 = vmul.f32 %v323_v18, %v298_v16 }
  0xe0   : > { %v325_v21 = vsub.f32 1.0, %v324_v20 }
  0xe2   : > { %v335_v24 = vrot.slane %v325_v21, %v334_v19  ;;  %vm404_vm1 = vcmp.ne.f32.partialorder %v325_v21, 0.0 }
  0xe3   : > { %v566_v25 = vsel %vm404_vm1, 1.0, %v765_v22 }
  0xe4   : > { %v336_v26 = vmul.f32 %v335_v24, %v295_v2  ;;  %v407_v27 = vmul.f32 %v566_v25, %v562_v23  ;;  %v348_v43 = vmul.f32 %v335_v24, %v296_v39 }
  0xe6   : > { %v337_v28 = vand.u32 2147483647, %v336_v26  ;;  %v409_v29 = vsel %vm408_vm2, %v407_v27, 0.0  ;;  %v346_v46 = vmax.f32 %v336_v26, 0.0  ;;  %v363_v51 = vmul.f32 %v336_v26, %v296_v39 }
  0xe7   : > { %410 = vadd.xlane.f32.xlu1 %v409_v29  ;;  %v349_v52 = vmul.f32 %v348_v43, %v336_v26 }
  0xe8   : > { %v338_v30 = vsub.f32 0.0, %v337_v28 }
  0xea   : > { %v339_v31 = vmul.f32 1.442695, %v338_v30 }
  0xec   : > { %648 = vpow2.f32 %v339_v31 }
  0xf9   : > { %v649_v33 = vpop.eup %648 }
  0xfa   : > { %v342_v35 = vadd.f32 1.0, %v649_v33  ;;  %vm341_vm5 = vcmp.lt.f32.partialorder %v649_v33, 0.001 }
  0xfc   : > { %650 = vlog2.f32 %v342_v35 }
 0x109   : > { %v651_v42 = vpop.eup %650 }
 0x10a   : > { %v344_v44 = vmul.f32 0.6931472, %v651_v42 }
 0x10c   : > { %v345_v48 = vsel %vm341_vm5, %v649_v33, %v344_v44 }
 0x10d   : > { %v347_v50 = vadd.f32 %v346_v46, %v345_v48 }
 0x10f   : > { %v364_v54 = vsub.f32 %v347_v50, %v363_v51  ;;  %v350_v56 = vsub.f32 %v347_v50, %v349_v52 }
 0x111   : > { %v369_v58 = vmul.f32 %v368_v49, %v364_v54  ;;  %v355_v59 = vmul.f32 %v354_v53, %v350_v56 }
 0x113   : > { %v376_v60 = vadd.f32 %v375_v55, %v369_v58  ;;  %v362_v61 = vadd.f32 %v361_v57, %v355_v59 }
 0x115   : > { %391 = vadd.xlane.f32.xlu1 %v376_v60  ;;  %378 = vadd.xlane.f32.xlu0 %v362_v61 }
 0x119   : > { %424 = vadd.xlane.f32.xlu1 %v423_v62 }
 0x170   : > { %v411_v63 = vpop.xlane.xlu1 %410 }
 0x171   : > { %v412_v0 = vrot.slane %v411_v63, 4 }
 0x173   : > { %v413_v1 = vadd.f32 %v412_v0, %v411_v63 }
 0x175   : > { %v414_v4 = vrot.slane %v413_v1, 2 }
 0x177   : > { %v415_v13 = vadd.f32 %v414_v4, %v413_v1 }
 0x179   : > { %v416_v20 = vrot.slane %v415_v13, 1 }
 0x17b   : > { %v417_v24 = vadd.f32 %v416_v20, %v415_v13 }
 0x19e   : > { %v392_v2 = vpop.xlane.xlu1 %391  ;;  %v379_v3 = vpop.xlane.xlu0 %378 }
 0x19f   : > { %v393_v5 = vrot.slane %v392_v2, 4  ;;  %v380_v6 = vrot.slane %v379_v3, 4 }
 0x1a1   : > { %v394_v7 = vadd.f32 %v393_v5, %v392_v2  ;;  %v381_v8 = vadd.f32 %v380_v6, %v379_v3 }
 0x1a2   : > { %v425_v9 = vpop.xlane.xlu1 %424 }
 0x1a3   : > { %v395_v10 = vrot.slane %v394_v7, 2  ;;  %v382_v11 = vrot.slane %v381_v8, 2  ;;  %v426_v12 = vrot.slane %v425_v9, 4 }
 0x1a5   : > { %v427_v14 = vadd.f32 %v426_v12, %v425_v9  ;;  %v383_v15 = vadd.f32 %v382_v11, %v381_v8  ;;  %v396_v16 = vadd.f32 %v395_v10, %v394_v7 }
 0x1a7   : > { %v428_v17 = vrot.slane %v427_v14, 2  ;;  %v384_v18 = vrot.slane %v383_v15, 1  ;;  %v397_v19 = vrot.slane %v396_v16, 1 }
 0x1a9   : > { %v429_v21 = vadd.f32 %v428_v17, %v427_v14  ;;  %v385_v22 = vadd.f32 %v384_v18, %v383_v15  ;;  %v398_v23 = vadd.f32 %v397_v19, %v396_v16 }
 0x1ab   : > { %576 = vpush %v385_v22  ;;  %v430_v25 = vrot.slane %v429_v21, 1 }
 0x1ac   : > { %578 = vpush %v398_v23 }
 0x1ad   : > { %580 = vpush %v417_v24  ;;  %v431_v26 = vadd.f32 %v430_v25, %v429_v21 }
 0x1af   : > { %582 = vpush %v431_v26 }
 0x1dc   : > { %s577_s25 = spop %576 }
 0x1dd   : > { %s387_s7 = sadd.f32 %s577_s25, %s377_s19  ;;  %s579_s10 = spop %578 }
 0x1de   : > { %s400_s14 = sadd.f32 %s579_s10, %s564_s30  ;;  %s581_s16 = spop %580 }
 0x1df   : > { %389 = sst [smem:[#allocation2]] %s387_s7  ;;  %s441_s11 = smul.f32 0.00041666668, %s387_s7 }
 0x1e0   : > { %402 = sst [smem:[#allocation2 + $0x1]] %s400_s14  ;;  %s583_s8 = spop %582 }
 0x1e1   : > { %s419_s12 = sadd.f32 %s581_s16, %s565_s29  ;;  %s443_s15 = smul.f32 0.00041666668, %s400_s14 }
 0x1e2   : > { %s433_s17 = sadd.f32 %s583_s8, %s567_s20 }
 0x1e3   : > { %421 = sst [smem:[#allocation2 + $0x2]] %s419_s12  ;;  %p446_p11 = scmp.gt.f32.partialorder %s419_s12, 0.0 }
 0x1e4   : > { %435 = sst [smem:[#allocation2 + $0x3]] %s433_s17  ;;  %p448_p13 = scmp.gt.f32.partialorder %s433_s17, 0.0 }
 0x1e5   : > { %s1000_s11 = smov (!%p446_p11, %s441_s11), 0.0 }
 0x1e6   : > { %s1002_s15 = smov (!%p448_p13, %s443_s15), %s1000_s11 }
 0x1e7   : > { %s451_s9 = smul.f32 %s450_s6, %s1002_s15 }
 0x1e9   : > { %s454_s23 = sadd.f32 %s453_s28, %s451_s9 }
 0x1eb   : > { %594 = sst [smem:[#allocation9]] (%p608_p1), %s454_s23 }
 0x1ec   : > { %596 = dma.smem_to_hbm (%p608_p1), %s767_s13, 16, %s981_s5, [#allocation6]  }
 0x1ed   : > { %743 = dma.done.wait (%p608_p1), [#allocation6], 16  }
 0x1ee   : > { %745 = vsyncadd (%p608_p1), [#allocation6], 4294967280 }
 0x1ef   : > { %470 = sfence }
 0x1f0 PF: > { %p20_p0 = scmp.ge.s32.totalorder %s823_s24, 5   ;;  %s995_s20 = smov %s752_s21 }
 0x1f1   : > { %s996_s21 = smov %s756_s22  ;;  %s997_s22 = smov %s833_s27 }
 0x1f2   : > { %s998_s23 = smov %s823_s24  ;;  %22 = sbr.rel (!%p20_p0) target bundleno = 8 (0x8), region = 110 }
 0x1f7   :  { %476 = vsyncpa [#allocation5], 1 }
 0x1f8   :  { %478 = vsyncpa [#allocation5 + $0x1], 1 }
 0x1f9   :  { %479 = vsyncpa [#allocation8], 1 }
 0x1fa   :  { %481 = vsyncpa [#allocation8 + $0x1], 1 }
 0x1fb   :  { %482 = vsyncpa [#allocation6], 1 }
 0x1fc   :  { %484 = vsyncpa [#allocation6 + $0x1], 1 }

</bundles_post_ra>
